<compile_context>
chip_gen: v7x
topology: tpu7x:2x2x1
jax: 0.10.0
libtpu: 0.0.40
codegen_flags: <defaults>
</compile_context>

<pallas_src>
import functools

import jax
import jax.numpy as jnp
from jax.experimental import pallas as pl
from jax.experimental.pallas import tpu as pltpu

LANE = 128  # lane-dense padded output width


def _round_up(n, m):
    return ((n + m - 1) // m) * m


def actor_kernel(x_ref, w1_ref, b1_ref, w2_ref, b2_ref,
                 w3_ref, b3_ref, w4_ref, b4_ref, out_ref,
                 *, n_actions, mxu_dtype):
    """One batch tile of the Actor MLP + masked, lane-dense softmax."""
    x = x_ref[...]  # (TM, F), already in mxu_dtype

    # fc1: (TM, F) @ (F, 32) + (1, 32), ReLU   (f32 accumulation)
    h = jnp.dot(x, w1_ref[...], preferred_element_type=jnp.float32) + b1_ref[...]
    h = jnp.maximum(h, 0.0)

    # fc2: (TM, 32) @ (32, 128) + (1, 128), ReLU
    h = jnp.dot(h.astype(mxu_dtype), w2_ref[...],
                preferred_element_type=jnp.float32) + b2_ref[...]
    h = jnp.maximum(h, 0.0)

    # fc3: (TM, 128) @ (128, 64) + (1, 64), ReLU
    h = jnp.dot(h.astype(mxu_dtype), w3_ref[...],
                preferred_element_type=jnp.float32) + b3_ref[...]
    h = jnp.maximum(h, 0.0)

    # fc4, padded to 128 output lanes for lane-dense stores.
    logits = jnp.dot(h.astype(mxu_dtype), w4_ref[...],
                     preferred_element_type=jnp.float32) + b4_ref[...]

    # Mask the padded lanes so they contribute nothing to the softmax.
    lane = jax.lax.broadcasted_iota(jnp.int32, logits.shape, dimension=1)
    logits = jnp.where(lane < n_actions, logits, -1e30)

    # Numerically-stable softmax; divide -> EUP reciprocal + VPU multiply.
    m = jnp.max(logits, axis=-1, keepdims=True)
    e = jnp.exp(logits - m)
    denom = jnp.sum(e, axis=-1, keepdims=True)
    out_ref[...] = (e * pl.reciprocal(denom, approx=False)).astype(out_ref.dtype)


def actor_forward(x, params, *, mxu_dtype=jnp.float32, tile_batch=512):
    """x: (B, n_features) f32 -> (B, n_actions) softmax probabilities."""
    B, F = x.shape
    n_actions = params["w4"].shape[1]

    # Lane-dense output: pad the last layer to 128 output lanes with zeros
    # (padded logits are masked inside the kernel before the softmax).
    w4 = jnp.zeros((params["w4"].shape[0], LANE), jnp.float32)
    w4 = w4.at[:, :n_actions].set(params["w4"])
    b4 = jnp.zeros((1, LANE), jnp.float32).at[:, :n_actions].set(params["b4"])

    # Cast MXU operands (x + weights) at the boundary; biases stay f32.
    w1 = params["w1"].astype(mxu_dtype)
    w2 = params["w2"].astype(mxu_dtype)
    w3 = params["w3"].astype(mxu_dtype)
    w4 = w4.astype(mxu_dtype)
    b1, b2, b3 = params["b1"], params["b2"], params["b3"]
    xq = x.astype(mxu_dtype)

    # Batch tiling. TM capped at 512: comfortably within scoped VMEM even on
    # v7x's 64 MiB (double-buffered (TM,F) input + (TM,128) f32 output).
    tm = min(tile_batch, _round_up(B, 8))
    Bp = _round_up(B, tm)
    if Bp != B:
        xq = jnp.pad(xq, ((0, Bp - B), (0, 0)))
    grid = (Bp // tm,)

    kern = functools.partial(actor_kernel, n_actions=n_actions,
                             mxu_dtype=mxu_dtype)

    def const(shape):  # weights/biases: same block every grid step -> resident
        return pl.BlockSpec(shape, lambda i: (0, 0))

    in_specs = [
        pl.BlockSpec((tm, F), lambda i: (i, 0)),
        const(w1.shape), const(b1.shape),
        const(w2.shape), const(b2.shape),
        const(w3.shape), const(b3.shape),
        const(w4.shape), const(b4.shape),
    ]
    out_specs = pl.BlockSpec((tm, LANE), lambda i: (i, 0))

    itemsize = jnp.dtype(mxu_dtype).itemsize
    macs = F * 32 + 32 * 128 + 128 * 64 + 64 * LANE
    cost = pl.CostEstimate(
        flops=2 * Bp * macs,
        transcendentals=Bp * (LANE + 1),
        bytes_accessed=(Bp * F * itemsize            # x
                        + macs * itemsize            # weights
                        + (32 + 128 + 64 + LANE) * 4 # biases (f32)
                        + Bp * LANE * 4),            # output (f32)
    )

    out = pl.pallas_call(
        kern,
        out_shape=jax.ShapeDtypeStruct((Bp, LANE), jnp.float32),
        grid=grid,
        in_specs=in_specs,
        out_specs=out_specs,
        compiler_params=pltpu.CompilerParams(
            dimension_semantics=("parallel",)),
        cost_estimate=cost,
    )(xq, w1, b1, w2, b2, w3, b3, w4, b4)

    return out[:B, :n_actions]


def init_actor_params(key, n_features, n_actions):
    """PyTorch Linear default init: U(-1/sqrt(fan_in), +1/sqrt(fan_in))."""
    dims = [(n_features, 32), (32, 128), (128, 64), (64, n_actions)]
    params = {}
    for i, (fan_in, fan_out) in enumerate(dims, start=1):
        key, kw, kb = jax.random.split(key, 3)
        bound = 1.0 / jnp.sqrt(jnp.float32(fan_in))
        params[f"w{i}"] = jax.random.uniform(
            kw, (fan_in, fan_out), jnp.float32, minval=-bound, maxval=bound)
        params[f"b{i}"] = jax.random.uniform(
            kb, (1, fan_out), jnp.float32, minval=-bound, maxval=bound)
    return params


def actor_reference(x, params):
    """Pure-JAX reference for correctness checking."""
    h = jnp.maximum(x @ params["w1"] + params["b1"], 0.0)
    h = jnp.maximum(h @ params["w2"] + params["b2"], 0.0)
    h = jnp.maximum(h @ params["w3"] + params["b3"], 0.0)
    logits = h @ params["w4"] + params["b4"]
    return jax.nn.softmax(logits, axis=-1)


if __name__ == "__main__":
    # CartPole-like dims: 4 observation features, 2 actions.
    n_features, n_actions = 4, 2

    key = jax.random.PRNGKey(0)
    key, kx1, kx2 = jax.random.split(key, 3)
    params = init_actor_params(key, n_features, n_actions)

    # --- small batch, f32 MXU path: exact check against the reference -------
    x_small = jax.random.normal(kx1, (8, n_features), dtype=jnp.float32)
    out = jax.block_until_ready(actor_forward(x_small, params))
    ref = actor_reference(x_small, params)
    assert out.shape == (8, n_actions)
    assert jnp.all(jnp.isfinite(out))
    assert jnp.allclose(jnp.sum(out, axis=-1), 1.0, atol=1e-5)
    assert jnp.allclose(out, ref, atol=1e-5, rtol=1e-5)

    # --- larger batch (multi-tile grid + batch padding), f32 ----------------
    x_big = jax.random.normal(kx2, (600, n_features), dtype=jnp.float32)
    out_big = jax.block_until_ready(actor_forward(x_big, params))
    ref_big = actor_reference(x_big, params)
    assert out_big.shape == (600, n_actions)
    assert jnp.allclose(out_big, ref_big, atol=1e-5, rtol=1e-5)

    # --- bf16 MXU-operand path (large-batch fast path): looser tolerance ----
    out_bf16 = jax.block_until_ready(
        actor_forward(x_big, params, mxu_dtype=jnp.bfloat16))
    assert jnp.all(jnp.isfinite(out_bf16))
    assert jnp.allclose(jnp.sum(out_bf16, axis=-1), 1.0, atol=1e-3)
    assert jnp.allclose(out_bf16, ref_big, atol=2e-2, rtol=2e-2)

    print("KERNEL_OK")
</pallas_src>

<mosaic_0001>
module attributes {stable_mosaic.version = 11 : i64} {
  func.func @actor_kernel(%arg0: i32, %arg1: memref<8x4xf32, #tpu.memory_space<vmem>>, %arg2: memref<4x32xf32, #tpu.memory_space<vmem>>, %arg3: memref<1x32xf32, #tpu.memory_space<vmem>>, %arg4: memref<32x128xf32, #tpu.memory_space<vmem>>, %arg5: memref<1x128xf32, #tpu.memory_space<vmem>>, %arg6: memref<128x64xf32, #tpu.memory_space<vmem>>, %arg7: memref<1x64xf32, #tpu.memory_space<vmem>>, %arg8: memref<64x128xf32, #tpu.memory_space<vmem>>, %arg9: memref<1x128xf32, #tpu.memory_space<vmem>>, %arg10: memref<8x128xf32, #tpu.memory_space<vmem>>) attributes {dimension_semantics = [#tpu.dimension_semantics<parallel>], iteration_bounds = array<i64: 1>, scalar_prefetch = 0 : i64, scratch_operands = 0 : i64, tpu.core_type = #tpu.core_type<tc>, window_params = [{transform_indices = @transform_0, window_bounds = array<i64: 8, 4>}, {pipeline_mode = #tpu.pipeline_mode<synchronous>, transform_indices = @transform_1, window_bounds = array<i64: 4, 32>}, {pipeline_mode = #tpu.pipeline_mode<synchronous>, transform_indices = @transform_2, window_bounds = array<i64: 1, 32>}, {pipeline_mode = #tpu.pipeline_mode<synchronous>, transform_indices = @transform_3, window_bounds = array<i64: 32, 128>}, {pipeline_mode = #tpu.pipeline_mode<synchronous>, transform_indices = @transform_4, window_bounds = array<i64: 1, 128>}, {pipeline_mode = #tpu.pipeline_mode<synchronous>, transform_indices = @transform_5, window_bounds = array<i64: 128, 64>}, {pipeline_mode = #tpu.pipeline_mode<synchronous>, transform_indices = @transform_6, window_bounds = array<i64: 1, 64>}, {pipeline_mode = #tpu.pipeline_mode<synchronous>, transform_indices = @transform_7, window_bounds = array<i64: 64, 128>}, {pipeline_mode = #tpu.pipeline_mode<synchronous>, transform_indices = @transform_8, window_bounds = array<i64: 1, 128>}, {transform_indices = @transform_9, window_bounds = array<i64: 8, 128>}]} {
    %c0 = arith.constant 0 : index
    %c0_0 = arith.constant 0 : index
    %0 = vector.load %arg1[%c0, %c0_0] : memref<8x4xf32, #tpu.memory_space<vmem>>, vector<8x4xf32>
    %c0_1 = arith.constant 0 : index
    %c0_2 = arith.constant 0 : index
    %1 = vector.load %arg2[%c0_1, %c0_2] : memref<4x32xf32, #tpu.memory_space<vmem>>, vector<4x32xf32>
    %cst = arith.constant dense<0.000000e+00> : vector<8x32xf32>
    %2 = tpu.matmul %0, %1, %cst {dimension_numbers = #tpu.dot_dimension_numbers<[1], [0], [0], [1], [0, 0, 1, 1], [], []>} : vector<8x4xf32>, vector<4x32xf32>, vector<8x32xf32> -> vector<8x32xf32>
    %c0_3 = arith.constant 0 : index
    %c0_4 = arith.constant 0 : index
    %3 = vector.load %arg3[%c0_3, %c0_4] : memref<1x32xf32, #tpu.memory_space<vmem>>, vector<1x32xf32>
    %4 = vector.broadcast %3 : vector<1x32xf32> to vector<8x32xf32>
    %5 = arith.addf %2, %4 : vector<8x32xf32>
    %cst_5 = arith.constant 0.000000e+00 : f32
    %6 = vector.broadcast %cst_5 : f32 to vector<8x32xf32>
    %7 = arith.maximumf %5, %6 : vector<8x32xf32>
    %c0_6 = arith.constant 0 : index
    %c0_7 = arith.constant 0 : index
    %8 = vector.load %arg4[%c0_6, %c0_7] : memref<32x128xf32, #tpu.memory_space<vmem>>, vector<32x128xf32>
    %cst_8 = arith.constant dense<0.000000e+00> : vector<8x128xf32>
    %9 = tpu.matmul %7, %8, %cst_8 {dimension_numbers = #tpu.dot_dimension_numbers<[1], [0], [0], [1], [0, 0, 1, 1], [], []>} : vector<8x32xf32>, vector<32x128xf32>, vector<8x128xf32> -> vector<8x128xf32>
    %c0_9 = arith.constant 0 : index
    %c0_10 = arith.constant 0 : index
    %10 = vector.load %arg5[%c0_9, %c0_10] : memref<1x128xf32, #tpu.memory_space<vmem>>, vector<1x128xf32>
    %11 = vector.broadcast %10 : vector<1x128xf32> to vector<8x128xf32>
    %12 = arith.addf %9, %11 : vector<8x128xf32>
    %cst_11 = arith.constant 0.000000e+00 : f32
    %13 = vector.broadcast %cst_11 : f32 to vector<8x128xf32>
    %14 = arith.maximumf %12, %13 : vector<8x128xf32>
    %c0_12 = arith.constant 0 : index
    %c0_13 = arith.constant 0 : index
    %15 = vector.load %arg6[%c0_12, %c0_13] : memref<128x64xf32, #tpu.memory_space<vmem>>, vector<128x64xf32>
    %cst_14 = arith.constant dense<0.000000e+00> : vector<8x64xf32>
    %16 = tpu.matmul %14, %15, %cst_14 {dimension_numbers = #tpu.dot_dimension_numbers<[1], [0], [0], [1], [0, 0, 1, 1], [], []>} : vector<8x128xf32>, vector<128x64xf32>, vector<8x64xf32> -> vector<8x64xf32>
    %c0_15 = arith.constant 0 : index
    %c0_16 = arith.constant 0 : index
    %17 = vector.load %arg7[%c0_15, %c0_16] : memref<1x64xf32, #tpu.memory_space<vmem>>, vector<1x64xf32>
    %18 = vector.broadcast %17 : vector<1x64xf32> to vector<8x64xf32>
    %19 = arith.addf %16, %18 : vector<8x64xf32>
    %cst_17 = arith.constant 0.000000e+00 : f32
    %20 = vector.broadcast %cst_17 : f32 to vector<8x64xf32>
    %21 = arith.maximumf %19, %20 : vector<8x64xf32>
    %c0_18 = arith.constant 0 : index
    %c0_19 = arith.constant 0 : index
    %22 = vector.load %arg8[%c0_18, %c0_19] : memref<64x128xf32, #tpu.memory_space<vmem>>, vector<64x128xf32>
    %cst_20 = arith.constant dense<0.000000e+00> : vector<8x128xf32>
    %23 = tpu.matmul %21, %22, %cst_20 {dimension_numbers = #tpu.dot_dimension_numbers<[1], [0], [0], [1], [0, 0, 1, 1], [], []>} : vector<8x64xf32>, vector<64x128xf32>, vector<8x128xf32> -> vector<8x128xf32>
    %c0_21 = arith.constant 0 : index
    %c0_22 = arith.constant 0 : index
    %24 = vector.load %arg9[%c0_21, %c0_22] : memref<1x128xf32, #tpu.memory_space<vmem>>, vector<1x128xf32>
    %25 = vector.broadcast %24 : vector<1x128xf32> to vector<8x128xf32>
    %26 = arith.addf %23, %25 : vector<8x128xf32>
    %27 = tpu.iota {dimensions = array<i32: 1>} : vector<8x128xi32>
    %c2_i32 = arith.constant 2 : i32
    %28 = vector.broadcast %c2_i32 : i32 to vector<8x128xi32>
    %29 = arith.cmpi slt, %27, %28 : vector<8x128xi32>
    %cst_23 = arith.constant -1.000000e+30 : f32
    %30 = vector.broadcast %cst_23 : f32 to vector<8x128xf32>
    %31 = arith.select %29, %26, %30 : vector<8x128xi1>, vector<8x128xf32>
    %cst_24 = arith.constant dense<0xFF800000> : vector<8xf32>
    %32 = vector.multi_reduction <maximumf>, %31, %cst_24 [1] : vector<8x128xf32> to vector<8xf32>
    %33 = vector.shape_cast %32 : vector<8xf32> to vector<8x1xf32>
    %34 = vector.broadcast %33 : vector<8x1xf32> to vector<8x128xf32>
    %35 = arith.subf %31, %34 : vector<8x128xf32>
    %36 = math.exp %35 : vector<8x128xf32>
    %cst_25 = arith.constant dense<0.000000e+00> : vector<8xf32>
    %37 = vector.multi_reduction <add>, %36, %cst_25 [1] : vector<8x128xf32> to vector<8xf32>
    %38 = vector.shape_cast %37 : vector<8xf32> to vector<8x1xf32>
    %39 = tpu.reciprocal %38 : vector<8x1xf32> -> vector<8x1xf32>
    %40 = vector.broadcast %39 : vector<8x1xf32> to vector<8x128xf32>
    %41 = arith.mulf %36, %40 : vector<8x128xf32>
    %c0_26 = arith.constant 0 : index
    %c0_27 = arith.constant 0 : index
    %42 = vector.load %arg10[%c0_26, %c0_27] : memref<8x128xf32, #tpu.memory_space<vmem>>, vector<8x128xf32>
    tpu.vector_store %arg10[%c0_26, %c0_27], %41 {strides = array<i32>} : memref<8x128xf32, #tpu.memory_space<vmem>>, vector<8x128xf32>,
    return
  }
  func.func @transform_0(%arg0: i32) -> (i32, i32) {
    %c0_i32 = arith.constant 0 : i32
    %c0_i32_0 = arith.constant 0 : i32
    return %arg0, %c0_i32 : i32, i32
  }
  func.func @transform_1(%arg0: i32) -> (i32, i32) {
    %c0_i32 = arith.constant 0 : i32
    %c0_i32_0 = arith.constant 0 : i32
    %c0_i32_1 = arith.constant 0 : i32
    return %c0_i32, %c0_i32_0 : i32, i32
  }
  func.func @transform_2(%arg0: i32) -> (i32, i32) {
    %c0_i32 = arith.constant 0 : i32
    %c0_i32_0 = arith.constant 0 : i32
    %c0_i32_1 = arith.constant 0 : i32
    return %c0_i32, %c0_i32_0 : i32, i32
  }
  func.func @transform_3(%arg0: i32) -> (i32, i32) {
    %c0_i32 = arith.constant 0 : i32
    %c0_i32_0 = arith.constant 0 : i32
    %c0_i32_1 = arith.constant 0 : i32
    return %c0_i32, %c0_i32_0 : i32, i32
  }
  func.func @transform_4(%arg0: i32) -> (i32, i32) {
    %c0_i32 = arith.constant 0 : i32
    %c0_i32_0 = arith.constant 0 : i32
    %c0_i32_1 = arith.constant 0 : i32
    return %c0_i32, %c0_i32_0 : i32, i32
  }
  func.func @transform_5(%arg0: i32) -> (i32, i32) {
    %c0_i32 = arith.constant 0 : i32
    %c0_i32_0 = arith.constant 0 : i32
    %c0_i32_1 = arith.constant 0 : i32
    return %c0_i32, %c0_i32_0 : i32, i32
  }
  func.func @transform_6(%arg0: i32) -> (i32, i32) {
    %c0_i32 = arith.constant 0 : i32
    %c0_i32_0 = arith.constant 0 : i32
    %c0_i32_1 = arith.constant 0 : i32
    return %c0_i32, %c0_i32_0 : i32, i32
  }
  func.func @transform_7(%arg0: i32) -> (i32, i32) {
    %c0_i32 = arith.constant 0 : i32
    %c0_i32_0 = arith.constant 0 : i32
    %c0_i32_1 = arith.constant 0 : i32
    return %c0_i32, %c0_i32_0 : i32, i32
  }
  func.func @transform_8(%arg0: i32) -> (i32, i32) {
    %c0_i32 = arith.constant 0 : i32
    %c0_i32_0 = arith.constant 0 : i32
    %c0_i32_1 = arith.constant 0 : i32
    return %c0_i32, %c0_i32_0 : i32, i32
  }
  func.func @transform_9(%arg0: i32) -> (i32, i32) {
    %c0_i32 = arith.constant 0 : i32
    %c0_i32_0 = arith.constant 0 : i32
    return %arg0, %c0_i32 : i32, i32
  }
}

</mosaic_0001>

<bundles_post_ra>
// kernel: tpu_custom_call.1
= control target key start
LH: loop header
LB: loop body
LE: loop exit
PB: predicated region body
PF: predicated region fallthrough
CT: control target
= control target key end

     0   :  { %vm46_vm0 = vcmask 1043456   ;;  %v603_v2 = vmov 0.0   ;;  %vm604_vm1 = vmmov 0   ;;  %vm42_vm2 = vcmask 31744   ;;  %s794_s0 = inlined_call_operand.vmem [shape: f32[8,4], index: 0, kind: input, shape index: {}]   ;;  %s795_s1 = inlined_call_operand.vmem [shape: f32[4,32], index: 1, kind: input, shape index: {}]   ;;  %s796_s2 = inlined_call_operand.vmem [shape: f32[1,32], index: 2, kind: input, shape index: {}]   ;;  %s797_s3 = inlined_call_operand.vmem [shape: f32[32,128], index: 3, kind: input, shape index: {}]   ;;  %s798_s4 = inlined_call_operand.vmem [shape: f32[1,128], index: 4, kind: input, shape index: {}]   ;;  %s799_s5 = inlined_call_operand.vmem [shape: f32[128,64], index: 5, kind: input, shape index: {}]   ;;  %s800_s6 = inlined_call_operand.vmem [shape: f32[1,64], index: 6, kind: input, shape index: {}]   ;;  %s801_s7 = inlined_call_operand.vmem [shape: f32[64,128], index: 7, kind: input, shape index: {}]   ;;  %s802_s8 = inlined_call_operand.vmem [shape: f32[1,128], index: 8, kind: input, shape index: {}]   ;;  %s803_s9 = inlined_call_operand.hbm [shape: f32[8,128], index: 9, kind: output, shape index: {}]  }
   0x1   :  { %v34_v0 = vld [vmem:[%s795_s1] sm:$0xf]  ;;  %459 = vmatprep.subr.mxu1 %v603_v2  ;;  %461 = vmatprep.mubr.msk.f32.mxu1 %vm604_vm1, %v603_v2  ;;  %v122_v4 = vld [vmem:[%s797_s3 + $0x8] sm:$0xff]  ;;  %v605_v6 = vmov 0.0|0.0  }
   0x2   :  { %v33_v1 = vld [vmem:[%s794_s0] sm:$0xff]  ;;  %460 = vmatpush3.msk.msra.mxu1 %vm46_vm0, %v34_v0  ;;  %535 = vmatprep.subr.bf16.mxu0 %v605_v6 }
   0x3   :  { %v121_v3 = vld [vmem:[%s797_s3] sm:$0xff] }
   0x4   :  { %v530_v5 = vpack.c.bf16 %v122_v4, %v121_v3 }
   0x5   :  { %14 = vsyncpa [#allocation3], 0  ;;  %462 = vmatmul.mubr.msk.f32.vlgmr.msra.gmra.mrb[0].mxu1 %vm42_vm2, %v33_v1  ;;  %529 = vmatprep.subr.bf16.mxu1 %v605_v6  ;;  %v123_v7 = vld [vmem:[%s797_s3 + $0x10] sm:$0xff]  ;;  %v124_v8 = vld [vmem:[%s797_s3 + $0x18] sm:$0xff]  ;;  %vm132_vm3 = vcmask 261120   ;;  %vm316_vm4 = vcmask 523264   ;;  %v390_v61 = vlaneseq }
   0x6   :  { %531 = vmatpush3.bf16.msra.mxu1 %v530_v5  ;;  %472 = vmatprep.mubr.msk.f32.mxu1 %vm604_vm1, %v603_v2  ;;  %v533_v9 = vpack.c.bf16 %v124_v8, %v123_v7  ;;  %v207_v10 = vld [vmem:[%s799_s5] sm:$0xff]  ;;  %v208_v11 = vld [vmem:[%s799_s5 + $0x8] sm:$0xff]  ;;  %v209_v12 = vld [vmem:[%s799_s5 + $0x10] sm:$0xff] }
   0x7   :  { %532 = vmatprep.subr.bf16.mxu1 %v605_v6  ;;  %507 = vmatprep.mubr.msk.f32.mxu0 %vm604_vm1, %v603_v2  ;;  %v536_v13 = vpack.c.bf16 %v208_v11, %v207_v10  ;;  %v210_v14 = vld [vmem:[%s799_s5 + $0x18] sm:$0xff]  ;;  %v211_v16 = vld [vmem:[%s799_s5 + $0x20] sm:$0xff]  ;;  %v212_v17 = vld [vmem:[%s799_s5 + $0x28] sm:$0xff]  ;;  %v391_v62 = vand.u32 127, %v390_v61 }
   0x8   :  { %v539_v15 = vpack.c.bf16 %v210_v14, %v209_v12  ;;  %v542_v18 = vpack.c.bf16 %v212_v17, %v211_v16  ;;  %v213_v19 = vld [vmem:[%s799_s5 + $0x30] sm:$0xff]  ;;  %v214_v20 = vld [vmem:[%s799_s5 + $0x38] sm:$0xff]  ;;  %v215_v22 = vld [vmem:[%s799_s5 + $0x40] sm:$0xff] }
   0x9   :  { %537 = vmatpush3.bf16.msra.mxu0 %v536_v13  ;;  %v545_v21 = vpack.c.bf16 %v214_v20, %v213_v19  ;;  %v216_v23 = vld [vmem:[%s799_s5 + $0x48] sm:$0xff]  ;;  %v217_v25 = vld [vmem:[%s799_s5 + $0x50] sm:$0xff]  ;;  %v218_v26 = vld [vmem:[%s799_s5 + $0x58] sm:$0xff]  ;;  %vm392_vm5 = vcmp.lt.s32.totalorder %v391_v62, 2 }
   0xa   :  { %534 = vmatpush3.bf16.msra.mxu1 %v533_v9  ;;  %538 = vmatprep.subr.bf16.mxu0 %v605_v6  ;;  %v548_v24 = vpack.c.bf16 %v216_v23, %v215_v22  ;;  %v551_v27 = vpack.c.bf16 %v218_v26, %v217_v25  ;;  %v219_v28 = vld [vmem:[%s799_s5 + $0x60] sm:$0xff]  ;;  %v220_v29 = vld [vmem:[%s799_s5 + $0x68] sm:$0xff]  ;;  %v221_v36 = vld [vmem:[%s799_s5 + $0x70] sm:$0xff] }
   0xb   :  { %559 = vmatprep.subr.bf16.mxu1 %v605_v6  ;;  %v554_v30 = vpack.c.bf16 %v220_v29, %v219_v28  ;;  %v418_v31 = vld [vmem:[%s796_s2] ss:$0 sm:$0xff]  ;;  %v222_v37 = vld [vmem:[%s799_s5 + $0x78] sm:$0xff]  ;;  %v302_v40 = vld [vmem:[%s801_s7 + $0x8] sm:$0xff] }
   0xc   :  { %v557_v38 = vpack.c.bf16 %v222_v37, %v221_v36  ;;  %v301_v39 = vld [vmem:[%s801_s7] sm:$0xff]  ;;  %v303_v41 = vld [vmem:[%s801_s7 + $0x10] sm:$0xff]  ;;  %v304_v43 = vld [vmem:[%s801_s7 + $0x18] sm:$0xff] }
   0xd   :  { %540 = vmatpush3.bf16.msra.mxu0 %v539_v15  ;;  %v560_v42 = vpack.c.bf16 %v302_v40, %v301_v39  ;;  %v563_v44 = vpack.c.bf16 %v304_v43, %v303_v41  ;;  %v305_v45 = vld [vmem:[%s801_s7 + $0x20] sm:$0xff]  ;;  %v306_v46 = vld [vmem:[%s801_s7 + $0x28] sm:$0xff]  ;;  %v307_v53 = vld [vmem:[%s801_s7 + $0x30] sm:$0xff] }
   0xe   :  { %541 = vmatprep.subr.bf16.mxu0 %v605_v6  ;;  %v566_v47 = vpack.c.bf16 %v306_v46, %v305_v45  ;;  %v421_v48 = vld [vmem:[%s798_s4] ss:$0 sm:$0xff]  ;;  %v308_v54 = vld [vmem:[%s801_s7 + $0x38] sm:$0xff] }
   0xf   :  { %v569_v55 = vpack.c.bf16 %v308_v54, %v307_v53  ;;  %v423_v56 = vld [vmem:[%s800_s6] ss:$0 sm:$0xff]  ;;  %s606_s6 = smov [#allocation2]  }
  0x10   :  { %v424_v63 = vld [vmem:[%s802_s8] ss:$0 sm:$0xff]  ;;  %s410_s7 = sshll.u32 %s606_s6, 4  ;;  %s411_s7 = int_to_ptr.vmem [resolvable:$true] %s410_s7 }
  0x11   :  { %543 = vmatpush3.bf16.msra.mxu0 %v542_v18  ;;  %s579_s8 = scalar_lea.vmem %s411_s7, 128  ;;  %p584_p1 = scmp.lt.s32.totalorder %s411_s7, %s411_s7 }
  0x12   :  { %544 = vmatprep.subr.bf16.mxu0 %v605_v6  ;;  %p580_p0 = scmp.ne.s32.totalorder %s411_s7, %s579_s8  ;;  %p585_p2 = scmp.lt.s32.totalorder %s579_s8, %s579_s8 }
  0x14   :  { %p586_p3 = por %p585_p2, %p584_p1 }
  0x15   :  { %546 = vmatpush3.bf16.msra.mxu0 %v545_v21 }
  0x16   :  { %547 = vmatprep.subr.bf16.mxu0 %v605_v6  ;;  %p587_p4 = pnand %p586_p3, %p580_p0 }
  0x19   :  { %549 = vmatpush3.bf16.msra.mxu0 %v548_v24 }
  0x1a   :  { %550 = vmatprep.subr.bf16.mxu0 %v605_v6 }
  0x1d   :  { %552 = vmatpush3.bf16.msra.mxu0 %v551_v27 }
  0x1e   :  { %553 = vmatprep.subr.bf16.mxu0 %v605_v6 }
  0x21   :  { %555 = vmatpush3.bf16.msra.mxu0 %v554_v30 }
  0x22   :  { %556 = vmatprep.subr.bf16.mxu0 %v605_v6 }
  0x25   :  { %558 = vmatpush3.bf16.msra.mxu0 %v557_v38 }
  0xd8   :  { %v116_v32 = vpop.f32.mrb[0].mxu1 }
  0xd9   :  { %v117_v33 = vadd.f32 %v418_v31, %v116_v32  ;;  %v463_v34 = vpop.f32.mrb[1].mxu1 }
  0xdb   :  { %v120_v35 = vmax.f32 %v117_v33, 0.0 }
  0xdd   :  { %473 = vmatmul.mubr.msk.f32.vlgmr.msra.gmra.mrb[2].mxu1 %vm132_vm3, %v120_v35 }
  0xde   :  { %526 = vmatprep.mubr.msk.f32.mxu1 %vm604_vm1, %v603_v2  ;;  %561 = vmatpush3.bf16.msra.mxu1 %v560_v42 }
  0xdf   :  { %562 = vmatprep.subr.bf16.mxu1 %v605_v6 }
  0xe2   :  { %564 = vmatpush3.bf16.msra.mxu1 %v563_v44 }
  0xe3   :  { %565 = vmatprep.subr.bf16.mxu1 %v605_v6 }
  0xe6   :  { %567 = vmatpush3.bf16.msra.mxu1 %v566_v47 }
  0xe7   :  { %568 = vmatprep.subr.bf16.mxu1 %v605_v6 }
  0xea   :  { %570 = vmatpush3.bf16.msra.mxu1 %v569_v55 }
 0x1b0   :  { %v202_v49 = vpop.f32.mrb[2].mxu1 }
 0x1b1   :  { %v203_v50 = vadd.f32 %v421_v48, %v202_v49  ;;  %v474_v51 = vpop.f32.mrb[3].mxu1 }
 0x1b3   :  { %v206_v52 = vmax.f32 %v203_v50, 0.0 }
 0x1b5   :  { %508 = vmatmul.mubr.f32.vlgmr.msra.gmra.mrb[0].mxu0 %v206_v52 }
 0x288   :  { %v296_v57 = vpop.f32.mrb[0].mxu0 }
 0x289   :  { %v297_v58 = vadd.f32 %v423_v56, %v296_v57  ;;  %v509_v59 = vpop.f32.mrb[1].mxu0 }
 0x28b   :  { %v300_v60 = vmax.f32 %v297_v58, 0.0 }
 0x28d   :  { %527 = vmatmul.mubr.msk.f32.vlgmr.msra.gmra.mrb[4].mxu1 %vm316_vm4, %v300_v60 }
 0x360   :  { %v386_v0 = vpop.f32.mrb[4].mxu1 }
 0x361   :  { %v387_v1 = vadd.f32 %v424_v63, %v386_v0  ;;  %v528_v2 = vpop.f32.mrb[5].mxu1 }
 0x363   :  { %v393_v3 = vsel %vm392_vm5, %v387_v1, -1e+30 }
 0x364   :  { %394 = vmax.xlane.f32.xlu0 %v393_v3 }
 0x3f1   :  { %v395_v4 = vpop.xlane.xlu0 %394 }
 0x3f2   :  { %v396_v5 = vsub.f32 %v393_v3, %v395_v4 }
 0x3f4   :  { %v397_v6 = vmul.f32 1.442695, %v396_v5 }
 0x3f6   :  { %575 = vpow2.f32 %v397_v6 }
 0x400   :  { %v576_v7 = vpop.eup %575 }
 0x401   :  { %399 = vadd.xlane.f32.xlu0 %v576_v7 }
 0x48e   :  { %v400_v8 = vpop.xlane.xlu0 %399 }
 0x48f   :  { %577 = vrcp.f32 %v400_v8 }
 0x499   :  { %v578_v9 = vpop.eup %577 }
 0x49a   :  { %v402_v10 = vmul.f32 %v578_v9, %v576_v7 }
 0x49c   :  { %403 = vst [vmem:[#allocation2] sm:$0xff] %v402_v10 }
 0x49d   :  { %590 = shalt.err (!%p587_p4)
}
 0x49e   :  { %s591_s26 = scalar_lea.hbm %s803_s9, 128 }
 0x49f   :  { %p592_p5 = scmp.ne.s32.totalorder %s803_s9, %s591_s26  ;;  %p595_p6 = scmp.lt.u32.totalorder %s591_s26, %s803_s9 }
 0x4a1   :  { %p597_p7 = pnand %p595_p6, %p592_p5 }
 0x4a3   :  { %600 = shalt.err (!%p597_p7)
}
 0x4a4   :  { %413 = dma.vmem_to_hbm [thread:$0]  %s411_s7, 128, %s803_s9, [#allocation3]  }
 0x4a5   :  { %601 = dma.done.wait [#allocation3], 128  }
 0x4a6   :  { %602 = vsyncadd [#allocation3], 4294967168 }
 0x4a7   :  { %417 = vsyncpa [#allocation3], 1 }

</bundles_post_ra>
